<compile_context>
chip_gen: v5e
topology: v5e:2x2
jax: 0.10.0
libtpu: 0.0.40
codegen_flags: <defaults>
</compile_context>

<pallas_src>
import jax
import jax.numpy as jnp
from jax.experimental import pallas as pl
from jax.experimental.pallas import tpu as pltpu

LANE = 128
SUBLANE = 8


def _round_up(x, m):
    return ((x + m - 1) // m) * m


def actor_kernel(x_ref, w1_ref, b1_ref, w2_ref, b2_ref, w3_ref, b3_ref, o_ref):
    # Feature-major: x is (state_dim, TN) bf16, batch on the 128-lane axis.
    x = x_ref[...]
    # fc1 + relu  (bf16 MXU inputs, f32 accumulation / epilogue)
    h1 = jnp.dot(w1_ref[...], x, preferred_element_type=jnp.float32) + b1_ref[...]
    h1 = jnp.maximum(h1, 0.0).astype(jnp.bfloat16)          # (H, TN)
    # fc2 + relu
    h2 = jnp.dot(w2_ref[...], h1, preferred_element_type=jnp.float32) + b2_ref[...]
    h2 = jnp.maximum(h2, 0.0).astype(jnp.bfloat16)          # (H, TN)
    # fc3 + tanh * 2 (tanh -> EUP slot; store is lane-dense over the batch)
    h3 = jnp.dot(w3_ref[...], h2, preferred_element_type=jnp.float32) + b3_ref[...]
    o_ref[...] = jnp.tanh(h3) * 2.0                          # (A_pad, TN) f32


def init_actor_params(key, state_dim, action_dim, hidden_dim=64):
    """Deterministic synthetic init, torch.nn.Linear convention: W is (out, in)."""
    ks = jax.random.split(key, 6)

    def linear(kw, kb, fan_in, fan_out):
        bound = 1.0 / jnp.sqrt(jnp.float32(fan_in))
        w = jax.random.uniform(kw, (fan_out, fan_in), jnp.float32, -bound, bound)
        b = jax.random.uniform(kb, (fan_out,), jnp.float32, -bound, bound)
        return w, b

    w1, b1 = linear(ks[0], ks[1], state_dim, hidden_dim)
    w2, b2 = linear(ks[2], ks[3], hidden_dim, hidden_dim)
    w3, b3 = linear(ks[4], ks[5], hidden_dim, action_dim)
    return {"w1": w1, "b1": b1, "w2": w2, "b2": b2, "w3": w3, "b3": b3}


def prepare_actor_params(params):
    """One-time prep (hoisted out of the per-step path): bf16 weights in
    torch-native (out,in) order, f32 (out,1) biases, fc3 out-dim padded to a
    multiple of 8 sublanes (zero rows -> tanh(0)*2 = 0, sliced off later)."""
    action_dim = params["w3"].shape[0]
    a_pad = _round_up(action_dim, SUBLANE)
    w3 = params["w3"]
    b3 = params["b3"].reshape(-1, 1)
    if a_pad != action_dim:
        w3 = jnp.pad(w3, ((0, a_pad - action_dim), (0, 0)))
        b3 = jnp.pad(b3, ((0, a_pad - action_dim), (0, 0)))
    return {
        "w1": params["w1"].astype(jnp.bfloat16),
        "b1": params["b1"].reshape(-1, 1).astype(jnp.float32),
        "w2": params["w2"].astype(jnp.bfloat16),
        "b2": params["b2"].reshape(-1, 1).astype(jnp.float32),
        "w3": w3.astype(jnp.bfloat16),
        "b3": b3.astype(jnp.float32),
        "action_dim": action_dim,
    }


def actor_forward(x, prep, tm=1024):
    """x: (batch, state_dim) float32.  prep: output of prepare_actor_params.
    tm: max batch-lane tile (sweep 512/1024/2048)."""
    batch, state_dim = x.shape
    hidden_dim = prep["w1"].shape[0]
    a_pad = prep["w3"].shape[0]
    action_dim = prep["action_dim"]

    # Balanced lane tiling of the batch: each tile is a multiple of 128 lanes,
    # total padding < one 128-lane group per tile (no pad-to-tile blowup).
    b_eff = _round_up(batch, LANE)
    n_blocks = max(1, pl.cdiv(b_eff, tm))
    tn = _round_up(pl.cdiv(b_eff, n_blocks), LANE)
    b_pad = tn * n_blocks

    # Feature-major input slab (state_dim, b_pad), bf16 for the MXU.
    x_t = jnp.pad(x.T.astype(jnp.bfloat16), ((0, 0), (0, b_pad - batch)))

    out = pl.pallas_call(
        actor_kernel,
        out_shape=jax.ShapeDtypeStruct((a_pad, b_pad), jnp.float32),
        grid_spec=pltpu.PrefetchScalarGridSpec(
            num_scalar_prefetch=0,
            grid=(n_blocks,),
            in_specs=[
                # x: tiled over batch lanes
                pl.BlockSpec((state_dim, tn), lambda i: (0, i)),
                # weights / biases: constant block index -> VMEM-resident
                pl.BlockSpec((hidden_dim, state_dim), lambda i: (0, 0)),
                pl.BlockSpec((hidden_dim, 1), lambda i: (0, 0)),
                pl.BlockSpec((hidden_dim, hidden_dim), lambda i: (0, 0)),
                pl.BlockSpec((hidden_dim, 1), lambda i: (0, 0)),
                pl.BlockSpec((a_pad, hidden_dim), lambda i: (0, 0)),
                pl.BlockSpec((a_pad, 1), lambda i: (0, 0)),
            ],
            out_specs=pl.BlockSpec((a_pad, tn), lambda i: (0, i)),
        ),
        compiler_params=pltpu.CompilerParams(
            # batch axis is independent -> shards across 2 TCs on v7x
            dimension_semantics=("parallel",),
        ),
    )(x_t, prep["w1"], prep["b1"], prep["w2"], prep["b2"], prep["w3"], prep["b3"])

    # Slice off padded action rows / padded batch lanes, return (batch, action_dim).
    return out[:action_dim, :batch].T


def ref_forward(x, params):
    """Plain-JAX reference mirroring the kernel's bf16-matmul / f32-epilogue."""
    h = jnp.dot(x.astype(jnp.bfloat16), params["w1"].T.astype(jnp.bfloat16),
                preferred_element_type=jnp.float32) + params["b1"]
    h = jnp.maximum(h, 0.0).astype(jnp.bfloat16)
    h = jnp.dot(h, params["w2"].T.astype(jnp.bfloat16),
                preferred_element_type=jnp.float32) + params["b2"]
    h = jnp.maximum(h, 0.0).astype(jnp.bfloat16)
    h = jnp.dot(h, params["w3"].T.astype(jnp.bfloat16),
                preferred_element_type=jnp.float32) + params["b3"]
    return jnp.tanh(h) * 2.0


if __name__ == "__main__":
    key = jax.random.PRNGKey(0)
    k_x, k_x2, k_p = jax.random.split(key, 3)

    state_dim, action_dim, hidden_dim = 16, 8, 64
    params = init_actor_params(k_p, state_dim, action_dim, hidden_dim)
    prep = prepare_actor_params(params)   # one-time weight prep

    # Small inference-style batch (single 128-lane block).
    batch = 8
    x = jax.random.normal(k_x, (batch, state_dim), dtype=jnp.float32)
    out = jax.block_until_ready(actor_forward(x, prep))
    ref = ref_forward(x, params)
    assert out.shape == (batch, action_dim)
    assert jnp.allclose(out, ref, atol=2e-2, rtol=2e-2)

    # Training-style batch (non-multiple of 128, exercises lane padding).
    batch2 = 300
    x2 = jax.random.normal(k_x2, (batch2, state_dim), dtype=jnp.float32)
    out2 = jax.block_until_ready(actor_forward(x2, prep, tm=1024))
    ref2 = ref_forward(x2, params)
    assert out2.shape == (batch2, action_dim)
    assert jnp.allclose(out2, ref2, atol=2e-2, rtol=2e-2)

    # Larger batch exercising the multi-step grid (>=2 blocks -> megacore path).
    batch3 = 2500
    x3 = jax.random.normal(jax.random.PRNGKey(3), (batch3, state_dim), dtype=jnp.float32)
    out3 = jax.block_until_ready(actor_forward(x3, prep, tm=1024))
    ref3 = ref_forward(x3, params)
    assert out3.shape == (batch3, action_dim)
    assert jnp.allclose(out3, ref3, atol=2e-2, rtol=2e-2)

    print("KERNEL_OK")
</pallas_src>

<mosaic_0001>
module attributes {stable_mosaic.version = 11 : i64} {
  func.func @actor_kernel(%arg0: i32, %arg1: memref<16x128xbf16, #tpu.memory_space<vmem>>, %arg2: memref<64x16xbf16, #tpu.memory_space<vmem>>, %arg3: memref<64x1xf32, #tpu.memory_space<vmem>>, %arg4: memref<64x64xbf16, #tpu.memory_space<vmem>>, %arg5: memref<64x1xf32, #tpu.memory_space<vmem>>, %arg6: memref<8x64xbf16, #tpu.memory_space<vmem>>, %arg7: memref<8x1xf32, #tpu.memory_space<vmem>>, %arg8: memref<8x128xf32, #tpu.memory_space<vmem>>) attributes {dimension_semantics = [#tpu.dimension_semantics<parallel>], iteration_bounds = array<i64: 1>, scalar_prefetch = 0 : i64, scratch_operands = 0 : i64, tpu.core_type = #tpu.core_type<tc>, window_params = [{transform_indices = @transform_0, window_bounds = array<i64: 16, 128>}, {pipeline_mode = #tpu.pipeline_mode<synchronous>, transform_indices = @transform_1, window_bounds = array<i64: 64, 16>}, {pipeline_mode = #tpu.pipeline_mode<synchronous>, transform_indices = @transform_2, window_bounds = array<i64: 64, 1>}, {pipeline_mode = #tpu.pipeline_mode<synchronous>, transform_indices = @transform_3, window_bounds = array<i64: 64, 64>}, {pipeline_mode = #tpu.pipeline_mode<synchronous>, transform_indices = @transform_4, window_bounds = array<i64: 64, 1>}, {pipeline_mode = #tpu.pipeline_mode<synchronous>, transform_indices = @transform_5, window_bounds = array<i64: 8, 64>}, {pipeline_mode = #tpu.pipeline_mode<synchronous>, transform_indices = @transform_6, window_bounds = array<i64: 8, 1>}, {transform_indices = @transform_7, window_bounds = array<i64: 8, 128>}]} {
    %c0 = arith.constant 0 : index
    %c0_0 = arith.constant 0 : index
    %0 = vector.load %arg1[%c0, %c0_0] : memref<16x128xbf16, #tpu.memory_space<vmem>>, vector<16x128xbf16>
    %c0_1 = arith.constant 0 : index
    %c0_2 = arith.constant 0 : index
    %1 = vector.load %arg2[%c0_1, %c0_2] : memref<64x16xbf16, #tpu.memory_space<vmem>>, vector<64x16xbf16>
    %cst = arith.constant dense<0.000000e+00> : vector<64x128xf32>
    %2 = tpu.matmul %1, %0, %cst {dimension_numbers = #tpu.dot_dimension_numbers<[1], [0], [0], [1], [0, 0, 1, 1], [], []>} : vector<64x16xbf16>, vector<16x128xbf16>, vector<64x128xf32> -> vector<64x128xf32>
    %c0_3 = arith.constant 0 : index
    %c0_4 = arith.constant 0 : index
    %3 = vector.load %arg3[%c0_3, %c0_4] : memref<64x1xf32, #tpu.memory_space<vmem>>, vector<64x1xf32>
    %4 = vector.broadcast %3 : vector<64x1xf32> to vector<64x128xf32>
    %5 = arith.addf %2, %4 : vector<64x128xf32>
    %cst_5 = arith.constant 0.000000e+00 : f32
    %6 = vector.broadcast %cst_5 : f32 to vector<64x128xf32>
    %7 = arith.maximumf %5, %6 : vector<64x128xf32>
    %8 = arith.truncf %7 : vector<64x128xf32> to vector<64x128xbf16>
    %c0_6 = arith.constant 0 : index
    %c0_7 = arith.constant 0 : index
    %9 = vector.load %arg4[%c0_6, %c0_7] : memref<64x64xbf16, #tpu.memory_space<vmem>>, vector<64x64xbf16>
    %cst_8 = arith.constant dense<0.000000e+00> : vector<64x128xf32>
    %10 = tpu.matmul %9, %8, %cst_8 {dimension_numbers = #tpu.dot_dimension_numbers<[1], [0], [0], [1], [0, 0, 1, 1], [], []>} : vector<64x64xbf16>, vector<64x128xbf16>, vector<64x128xf32> -> vector<64x128xf32>
    %c0_9 = arith.constant 0 : index
    %c0_10 = arith.constant 0 : index
    %11 = vector.load %arg5[%c0_9, %c0_10] : memref<64x1xf32, #tpu.memory_space<vmem>>, vector<64x1xf32>
    %12 = vector.broadcast %11 : vector<64x1xf32> to vector<64x128xf32>
    %13 = arith.addf %10, %12 : vector<64x128xf32>
    %cst_11 = arith.constant 0.000000e+00 : f32
    %14 = vector.broadcast %cst_11 : f32 to vector<64x128xf32>
    %15 = arith.maximumf %13, %14 : vector<64x128xf32>
    %16 = arith.truncf %15 : vector<64x128xf32> to vector<64x128xbf16>
    %c0_12 = arith.constant 0 : index
    %c0_13 = arith.constant 0 : index
    %17 = vector.load %arg6[%c0_12, %c0_13] : memref<8x64xbf16, #tpu.memory_space<vmem>>, vector<8x64xbf16>
    %cst_14 = arith.constant dense<0.000000e+00> : vector<8x128xf32>
    %18 = tpu.matmul %17, %16, %cst_14 {dimension_numbers = #tpu.dot_dimension_numbers<[1], [0], [0], [1], [0, 0, 1, 1], [], []>} : vector<8x64xbf16>, vector<64x128xbf16>, vector<8x128xf32> -> vector<8x128xf32>
    %c0_15 = arith.constant 0 : index
    %c0_16 = arith.constant 0 : index
    %19 = vector.load %arg7[%c0_15, %c0_16] : memref<8x1xf32, #tpu.memory_space<vmem>>, vector<8x1xf32>
    %20 = vector.broadcast %19 : vector<8x1xf32> to vector<8x128xf32>
    %21 = arith.addf %18, %20 : vector<8x128xf32>
    %22 = math.tanh %21 : vector<8x128xf32>
    %cst_17 = arith.constant 2.000000e+00 : f32
    %23 = vector.broadcast %cst_17 : f32 to vector<8x128xf32>
    %24 = arith.mulf %22, %23 : vector<8x128xf32>
    %c0_18 = arith.constant 0 : index
    %c0_19 = arith.constant 0 : index
    %25 = vector.load %arg8[%c0_18, %c0_19] : memref<8x128xf32, #tpu.memory_space<vmem>>, vector<8x128xf32>
    tpu.vector_store %arg8[%c0_18, %c0_19], %24 {strides = array<i32>} : memref<8x128xf32, #tpu.memory_space<vmem>>, vector<8x128xf32>,
    return
  }
  func.func @transform_0(%arg0: i32) -> (i32, i32) {
    %c0_i32 = arith.constant 0 : i32
    %c0_i32_0 = arith.constant 0 : i32
    return %c0_i32, %arg0 : i32, i32
  }
  func.func @transform_1(%arg0: i32) -> (i32, i32) {
    %c0_i32 = arith.constant 0 : i32
    %c0_i32_0 = arith.constant 0 : i32
    %c0_i32_1 = arith.constant 0 : i32
    return %c0_i32, %c0_i32_0 : i32, i32
  }
  func.func @transform_2(%arg0: i32) -> (i32, i32) {
    %c0_i32 = arith.constant 0 : i32
    %c0_i32_0 = arith.constant 0 : i32
    %c0_i32_1 = arith.constant 0 : i32
    return %c0_i32, %c0_i32_0 : i32, i32
  }
  func.func @transform_3(%arg0: i32) -> (i32, i32) {
    %c0_i32 = arith.constant 0 : i32
    %c0_i32_0 = arith.constant 0 : i32
    %c0_i32_1 = arith.constant 0 : i32
    return %c0_i32, %c0_i32_0 : i32, i32
  }
  func.func @transform_4(%arg0: i32) -> (i32, i32) {
    %c0_i32 = arith.constant 0 : i32
    %c0_i32_0 = arith.constant 0 : i32
    %c0_i32_1 = arith.constant 0 : i32
    return %c0_i32, %c0_i32_0 : i32, i32
  }
  func.func @transform_5(%arg0: i32) -> (i32, i32) {
    %c0_i32 = arith.constant 0 : i32
    %c0_i32_0 = arith.constant 0 : i32
    %c0_i32_1 = arith.constant 0 : i32
    return %c0_i32, %c0_i32_0 : i32, i32
  }
  func.func @transform_6(%arg0: i32) -> (i32, i32) {
    %c0_i32 = arith.constant 0 : i32
    %c0_i32_0 = arith.constant 0 : i32
    %c0_i32_1 = arith.constant 0 : i32
    return %c0_i32, %c0_i32_0 : i32, i32
  }
  func.func @transform_7(%arg0: i32) -> (i32, i32) {
    %c0_i32 = arith.constant 0 : i32
    %c0_i32_0 = arith.constant 0 : i32
    return %c0_i32, %arg0 : i32, i32
  }
}

</mosaic_0001>

<bundles_post_ra>
// kernel: tpu_custom_call.1
= control target key start
LH: loop header
LB: loop body
LE: loop exit
PB: predicated region body
PF: predicated region fallthrough
CT: control target
= control target key end

     0   :  { %v434_v2 = vmov 0   ;;  %vm112_vm0 = vcmask 130048   ;;  %s569_s0 = inlined_call_operand.vmem [shape: bf16[16,128], index: 0, kind: input, shape index: {}]   ;;  %s570_s1 = inlined_call_operand.vmem [shape: bf16[64,16], index: 1, kind: input, shape index: {}]   ;;  %s571_s2 = inlined_call_operand.vmem [shape: f32[64,1], index: 2, kind: input, shape index: {}]   ;;  %s572_s3 = inlined_call_operand.vmem [shape: bf16[64,64], index: 3, kind: input, shape index: {}]   ;;  %s573_s4 = inlined_call_operand.vmem [shape: f32[64,1], index: 4, kind: input, shape index: {}]   ;;  %s574_s5 = inlined_call_operand.vmem [shape: bf16[8,64], index: 5, kind: input, shape index: {}]   ;;  %s575_s6 = inlined_call_operand.vmem [shape: f32[8,1], index: 6, kind: input, shape index: {}]   ;;  %s576_s7 = inlined_call_operand.hbm [shape: f32[8,128], index: 7, kind: output, shape index: {}]  }
   0x1   :  { %v44_v0 = vld [vmem:[%s571_s2 + $0x30] sm:$0xff]  ;;  %v383_v1 = vld [vmem:[%s569_s0] sm:$0xff]  ;;  %403 = vset.pattern.permute.xlu0 %v434_v2  ;;  %404 = vset.pattern.permute.xlu1 %v434_v2  ;;  %v387_v5 = vld [vmem:[%s570_s1 + $0x18] sm:$0xff] }
   0x2   :  { %v384_v3 = vld [vmem:[%s570_s1] sm:$0xff]  ;;  %78 = vperm.xlu0 %403, %v44_v0   ;;  %132 = vmatpush.bf16.msra.mxu0 %v383_v1 }
   0x3   :  { %v42_v4 = vld [vmem:[%s571_s2 + $0x20] sm:$0xff]  ;;  %392 = vmatpush.bf16.msra.mxu1 %v383_v1  ;;  %405 = vset.pattern.permute.xlu2 %v434_v2 }
   0x4   :  { %68 = vperm.xlu1 %404, %v42_v4  }
   0x5   :  { %12 = vsyncpa [#allocation3], 0  ;;  %358 = vmatmul.msk.bf16.vlgmr.msra.gmra.mxu0 %vm112_vm0, %v384_v3  ;;  %v40_v6 = vld [vmem:[%s571_s2 + $0x10] sm:$0xff]  ;;  %v45_v7 = vld [vmem:[%s571_s2 + $0x38] sm:$0xff]  ;;  %vm242_vm1 = vcmask 523264   ;;  %s435_s25 = smov [#allocation2]  }
   0x6   :  { %361 = vmatmul.msk.bf16.vlgmr.msra.gmra.mxu1 %vm112_vm0, %v387_v5  ;;  %58 = vperm.xlu2 %405, %v40_v6   ;;  %v43_v8 = vld [vmem:[%s571_s2 + $0x28] sm:$0xff]  ;;  %v41_v9 = vld [vmem:[%s571_s2 + $0x18] sm:$0xff]  ;;  %v38_v10 = vld [vmem:[%s571_s2] sm:$0xff]  ;;  %s327_s26 = sshll.u32 %s435_s25, 4  ;;  %s329_s29 = sshll.u32 %s576_s7, 4  ;;  %s328_s26 = int_to_ptr.vmem [resolvable:$true] %s327_s26  ;;  %s330_s29 = int_to_ptr.hbm [resolvable:$true] %s329_s29 }
   0x7   :  { %v39_v11 = vld [vmem:[%s571_s2 + $0x8] sm:$0xff]  ;;  %v180_v13 = vld [vmem:[%s573_s4 + $0x30] sm:$0xff]  ;;  %v181_v14 = vld [vmem:[%s573_s4 + $0x38] sm:$0xff] }
   0x8   :  { %v385_v12 = vld [vmem:[%s570_s1 + $0x8] sm:$0xff]  ;;  %v178_v15 = vld [vmem:[%s573_s4 + $0x20] sm:$0xff]  ;;  %v176_v17 = vld [vmem:[%s573_s4 + $0x10] sm:$0xff] }
   0x9   :  { %v179_v16 = vld [vmem:[%s573_s4 + $0x28] sm:$0xff]  ;;  %v177_v18 = vld [vmem:[%s573_s4 + $0x18] sm:$0xff]  ;;  %v386_v19 = vld [vmem:[%s570_s1 + $0x10] sm:$0xff] }
   0xa   :  { %83 = vperm.xlu0 %403, %v45_v7   ;;  %v174_v20 = vld [vmem:[%s573_s4] sm:$0xff]  ;;  %v175_v21 = vld [vmem:[%s573_s4 + $0x8] sm:$0xff]  ;;  %v390_v61 = vld [vmem:[%s572_s3 + $0x10] sm:$0xff] }
   0xb   :  { %v297_v22 = vld [vmem:[%s575_s6] sm:$0xff]  ;;  %v389_v60 = vld [vmem:[%s572_s3 + $0x8] sm:$0xff]  ;;  %v391_v62 = vld [vmem:[%s572_s3 + $0x18] sm:$0xff] }
   0xc   :  { %73 = vperm.xlu1 %404, %v43_v8   ;;  %v388_v59 = vld [vmem:[%s572_s3] sm:$0xff] }
   0xe   :  { %63 = vperm.xlu2 %405, %v41_v9  }
  0x12   :  { %48 = vperm.xlu0 %403, %v38_v10  }
  0x14   :  { %53 = vperm.xlu1 %404, %v39_v11  }
  0x15   :  { %359 = vmatmul.msk.bf16.gmra.mxu0 %vm112_vm0, %v385_v12 }
  0x16   :  { %214 = vperm.xlu2 %405, %v180_v13  }
  0x1a   :  { %219 = vperm.xlu0 %403, %v181_v14  }
  0x1c   :  { %204 = vperm.xlu1 %404, %v178_v15  }
  0x1e   :  { %209 = vperm.xlu2 %405, %v179_v16  }
  0x22   :  { %194 = vperm.xlu0 %403, %v176_v17  }
  0x24   :  { %199 = vperm.xlu1 %404, %v177_v18  }
  0x25   :  { %360 = vmatmul.msk.bf16.gmra.mxu0 %vm112_vm0, %v386_v19 }
  0x26   :  { %184 = vperm.xlu2 %405, %v174_v20  }
  0x2a   :  { %189 = vperm.xlu0 %403, %v175_v21  }
  0x2c   :  { %300 = vperm.xlu1 %404, %v297_v22  }
  0x60   :  { %v59_v37 = vpop.permute.xlu2 %58 }
  0x68   :  { %v64_v41 = vpop.permute.xlu2 %63 }
  0x70   :  { %v215_v2 = vpop.permute.xlu2 %214 }
  0x74   :  { %v79_v23 = vpop.permute.xlu0 %78 }
  0x76   :  { %v69_v35 = vpop.permute.xlu1 %68 }
  0x78   :  { %v210_v9 = vpop.permute.xlu2 %209 }
  0x7c   :  { %v84_v28 = vpop.permute.xlu0 %83 }
  0x7e   :  { %v74_v38 = vpop.permute.xlu1 %73 }
  0x82   :  { %v134_v24 = vpop.f32.mrf.mxu0 }
  0x83   :  { %v149_v25 = vpop.f32.mrf.mxu1 }
  0x84   :  { %v150_v26 = vadd.f32 %v149_v25, %v79_v23  ;;  %v49_v49 = vpop.permute.xlu0 %48 }
  0x85   :  { %v135_v53 = vadd.f32 %v134_v24, %v49_v49 }
  0x86   :  { %v160_v30 = vmax.f32 %v150_v26, 0.0  ;;  %v54_v45 = vpop.permute.xlu1 %53 }
  0x87   :  { %v154_v57 = vmax.f32 %v135_v53, 0.0 }
  0x8a   :  { %v136_v27 = vpop.f32.mrf.mxu0 }
  0x8b   :  { %v151_v29 = vpop.f32.mrf.mxu1  ;;  %v137_v50 = vadd.f32 %v136_v27, %v54_v45 }
  0x8c   :  { %v152_v31 = vadd.f32 %v151_v29, %v84_v28  ;;  %v220_v1 = vpop.permute.xlu0 %219  ;;  %v185_v28 = vpop.permute.xlu2 %184 }
  0x8d   :  { %v155_v55 = vmax.f32 %v137_v50, 0.0 }
  0x8e   :  { %v161_v32 = vmax.f32 %v152_v31, 0.0  ;;  %v205_v5 = vpop.permute.xlu1 %204 }
  0x8f   :  { %v162_v58 = vpack.c.bf16 %v155_v55, %v154_v57 }
  0x90   :  { %v165_v33 = vpack.c.bf16 %v161_v32, %v160_v30 }
  0x92   :  { %v139_v34 = vpop.f32.mrf.mxu0  ;;  %259 = vmatpush.bf16.msrb.mxu1 %v165_v33  ;;  %393 = vmatpush.bf16.msra.mxu2 %v165_v33 }
  0x93   :  { %394 = vmatpush.bf16.msra.mxu3 %v165_v33  ;;  %v140_v46 = vadd.f32 %v139_v34, %v59_v37 }
  0x94   :  { %v195_v7 = vpop.permute.xlu0 %194 }
  0x95   :  { %v156_v54 = vmax.f32 %v140_v46, 0.0 }
  0x96   :  { %v200_v17 = vpop.permute.xlu1 %199 }
  0x9a   :  { %v141_v36 = vpop.f32.mrf.mxu0 }
  0x9b   :  { %v142_v43 = vadd.f32 %v141_v36, %v64_v41 }
  0x9c   :  { %v190_v24 = vpop.permute.xlu0 %189 }
  0x9d   :  { %v157_v51 = vmax.f32 %v142_v43, 0.0 }
  0x9e   :  { %v301_v36 = vpop.permute.xlu1 %300 }
  0x9f   :  { %v163_v56 = vpack.c.bf16 %v157_v51, %v156_v54 }
  0xa2   :  { %v144_v39 = vpop.f32.mrf.mxu0 }
  0xa3   :  { %v145_v40 = vadd.f32 %v144_v39, %v69_v35  ;;  %v296_v35 = vld [vmem:[%s574_s5] sm:$0xf] }
  0xa5   :  { %v158_v47 = vmax.f32 %v145_v40, 0.0 }
  0xaa   :  { %v146_v42 = vpop.f32.mrf.mxu0 }
  0xab   :  { %v147_v44 = vadd.f32 %v146_v42, %v74_v38 }
  0xad   :  { %v159_v48 = vmax.f32 %v147_v44, 0.0 }
  0xaf   :  { %v164_v52 = vpack.c.bf16 %v159_v48, %v158_v47 }
  0xb1   :  { %260 = vmatpush.bf16.msrb.mxu1 %v164_v52  ;;  %395 = vmatpush.bf16.msra.mxu2 %v164_v52 }
  0xb2   :  { %396 = vmatpush.bf16.msra.mxu3 %v164_v52 }
  0xb5   :  { %261 = vmatpush.bf16.msrb.mxu1 %v163_v56  ;;  %397 = vmatpush.bf16.msra.mxu2 %v163_v56 }
  0xb6   :  { %398 = vmatpush.bf16.msra.mxu3 %v163_v56 }
  0xb9   :  { %262 = vmatpush.bf16.msrb.mxu1 %v162_v58  ;;  %399 = vmatpush.bf16.msra.mxu2 %v162_v58 }
  0xba   :  { %400 = vmatpush.bf16.msra.mxu3 %v162_v58 }
  0xbc   :  { %378 = vmatmul.msk.bf16.vlgmr.msrb.gmra.mxu1 %vm242_vm1, %v388_v59  ;;  %379 = vmatmul.msk.bf16.vlgmr.msra.gmra.mxu2 %vm242_vm1, %v389_v60 }
  0xbd   :  { %380 = vmatmul.msk.bf16.vlgmr.msra.gmra.mxu3 %vm242_vm1, %v390_v61 }
  0xcd   :  { %381 = vmatmul.msk.bf16.gmra.mxu3 %vm242_vm1, %v391_v62 }
 0x139   :  { %v264_v6 = vpop.f32.mrf.mxu1 }
 0x13a   :  { %v265_v29 = vadd.f32 %v264_v6, %v185_v28 }
 0x13c   :  { %v284_v33 = vmax.f32 %v265_v29, 0.0 }
 0x13f   :  { %v269_v3 = vpop.f32.mrf.mxu2 }
 0x140   :  { %v274_v63 = vpop.f32.mrf.mxu3  ;;  %v270_v22 = vadd.f32 %v269_v3, %v195_v7 }
 0x141   :  { %v275_v14 = vadd.f32 %v274_v63, %v205_v5  ;;  %v266_v21 = vpop.f32.mrf.mxu1 }
 0x142   :  { %v267_v25 = vadd.f32 %v266_v21, %v190_v24  ;;  %v286_v30 = vmax.f32 %v270_v22, 0.0 }
 0x143   :  { %v288_v23 = vmax.f32 %v275_v14, 0.0 }
 0x144   :  { %v285_v31 = vmax.f32 %v267_v25, 0.0 }
 0x146   :  { %v292_v34 = vpack.c.bf16 %v285_v31, %v284_v33 }
 0x147   :  { %v271_v13 = vpop.f32.mrf.mxu2 }
 0x148   :  { %v276_v0 = vpop.f32.mrf.mxu3  ;;  %v272_v18 = vadd.f32 %v271_v13, %v200_v17 }
 0x149   :  { %v277_v11 = vadd.f32 %v276_v0, %v210_v9 }
 0x14a   :  { %v287_v26 = vmax.f32 %v272_v18, 0.0 }
 0x14b   :  { %v289_v19 = vmax.f32 %v277_v11, 0.0 }
 0x14c   :  { %v293_v32 = vpack.c.bf16 %v287_v26, %v286_v30 }
 0x14d   :  { %v294_v27 = vpack.c.bf16 %v289_v19, %v288_v23 }
 0x150   :  { %v279_v4 = vpop.f32.mrf.mxu3 }
 0x151   :  { %v280_v8 = vadd.f32 %v279_v4, %v215_v2 }
 0x153   :  { %v290_v15 = vmax.f32 %v280_v8, 0.0 }
 0x158   :  { %v281_v10 = vpop.f32.mrf.mxu3 }
 0x159   :  { %v282_v12 = vadd.f32 %v281_v10, %v220_v1 }
 0x15b   :  { %v291_v16 = vmax.f32 %v282_v12, 0.0 }
 0x15d   :  { %v295_v20 = vpack.c.bf16 %v291_v16, %v290_v15 }
 0x15f   :  { %310 = vmatpush.bf16.msrb.mxu2 %v295_v20 }
 0x163   :  { %311 = vmatpush.bf16.msrb.mxu2 %v294_v27 }
 0x167   :  { %312 = vmatpush.bf16.msrb.mxu2 %v293_v32 }
 0x16b   :  { %313 = vmatpush.bf16.msrb.mxu2 %v292_v34 }
 0x16e   :  { %382 = vmatmul.msk.bf16.vlgmr.msrb.gmra.mxu2 %vm242_vm1, %v296_v35 }
 0x1f1   :  { %v315_v37 = vpop.f32.mrf.mxu2 }
 0x1f2   :  { %v316_v38 = vadd.f32 %v315_v37, %v301_v36 }
 0x1f4   :  { %406 = vtanh.f32 %v316_v38 }
 0x1f9   :  { %v317_v39 = vpop.f32.mrf.mxu2 }
 0x1fa   :  { %v407_v40 = vpop.eup %406 }
 0x1fb   :  { %v320_v41 = vmul.f32 2.0, %v407_v40 }
 0x1fd   :  { %321 = vst [vmem:[#allocation2] sm:$0xff] %v320_v41 }
 0x1fe   :  { %332 = dma.vmem_to_hbm [thread:$0]  %s328_s26, 128, %s330_s29, [#allocation3]  }
 0x1ff   :  { %432 = dma.done.wait [#allocation3], 128  }
 0x200   :  { %433 = vsyncadd [#allocation3], 4294967168 }
 0x201   :  { %337 = vsyncpa [#allocation3], 1 }

</bundles_post_ra>
